<compile_context>
chip_gen: v7x
topology: tpu7x:2x2x1
jax: 0.10.0
libtpu: 0.0.40
codegen_flags: <defaults>
</compile_context>

<pallas_src>
import functools

import jax
import jax.numpy as jnp
from jax.experimental import pallas as pl
from jax.experimental.pallas import tpu as pltpu


def _unshuffle_kernel(x_ref, p_ref, s_ref, o_ref, *, r, Ho, Wo):
    # x_ref: (1, H, W)        one (b, c) spatial slab (VMEM resident)
    # p_ref: (H, H)           row-phase permutation matrix (0/1, f32)
    # s_ref: (W, W)           column-phase permutation matrix (0/1, f32)
    # o_ref: (1, r*r, Ho, Wo) all r*r output channel planes for this slab
    x = x_ref[0].astype(jnp.float32)          # (H, W)
    p = p_ref[...]                            # (H, H)
    s = s_ref[...]                            # (W, W)

    # Z[i*Ho + oh, j*Wo + ow] = x[oh*r + i, ow*r + j]
    # (permutation-as-matmul on the MXU; exact with 0/1 weights + f32 acc)
    z = jnp.dot(p, x, preferred_element_type=jnp.float32)
    z = jnp.dot(z, s, preferred_element_type=jnp.float32)

    # Each output channel plane is a contiguous static slice of Z; write it
    # straight into the final NCHW layout (lane-dense / unmasked once Wo>=128).
    for i in range(r):
        for j in range(r):
            plane = z[i * Ho:(i + 1) * Ho, j * Wo:(j + 1) * Wo]
            o_ref[0, i * r + j, :, :] = plane.astype(o_ref.dtype)


@functools.partial(jax.jit, static_argnames=("r",))
def pixel_unshuffle(x, r):
    """PyTorch-equivalent pixel_unshuffle for NCHW input via one Pallas kernel."""
    B, C, H, W = x.shape
    if H % r or W % r:
        raise ValueError(f"spatial dims {(H, W)} not divisible by r={r}")
    if r == 1:
        return x
    Ho, Wo = H // r, W // r

    # Constant 0/1 permutation matrices applied on the MXU inside the kernel.
    #   (P @ x)[m, w]  = x[(m % Ho)*r + m//Ho, w]          (row phases)
    #   (z @ S)[m, k]  = z[m, w]  with  k = (w % r)*Wo + w//r  (col phases)
    m = jnp.arange(H)
    P = ((m % Ho) * r + (m // Ho))[:, None] == jnp.arange(H)[None, :]
    P = P.astype(jnp.float32)
    w = jnp.arange(W)
    S = ((w % r) * Wo + (w // r))[:, None] == jnp.arange(W)[None, :]
    S = S.astype(jnp.float32)

    xc = x.reshape(B * C, H, W)

    flops = 2 * (B * C) * (H * H * W + H * W * W)
    bytes_accessed = (
        (xc.size + B * C * r * r * Ho * Wo) * x.dtype.itemsize
        + (H * H + W * W) * 4
    )

    out = pl.pallas_call(
        functools.partial(_unshuffle_kernel, r=r, Ho=Ho, Wo=Wo),
        out_shape=jax.ShapeDtypeStruct((B * C, r * r, Ho, Wo), x.dtype),
        grid=(B * C,),
        in_specs=[
            pl.BlockSpec((1, H, W), lambda n: (n, 0, 0)),
            pl.BlockSpec((H, H), lambda n: (0, 0)),   # resident, never re-fetched
            pl.BlockSpec((W, W), lambda n: (0, 0)),   # resident, never re-fetched
        ],
        out_specs=pl.BlockSpec((1, r * r, Ho, Wo), lambda n: (n, 0, 0, 0)),
        compiler_params=pltpu.CompilerParams(
            dimension_semantics=("parallel",)),       # shard slabs across TCs (v7x)
        cost_estimate=pl.CostEstimate(
            flops=flops, transcendentals=0, bytes_accessed=bytes_accessed),
    )(xc, P, S)

    return out.reshape(B, C * r * r, Ho, Wo)


def pixel_unshuffle_reference(x, r):
    """Plain-JAX reference matching torch pixel_unshuffle exactly."""
    B, C, H, W = x.shape
    y = x.reshape(B, C, H // r, r, W // r, r)
    y = jnp.transpose(y, (0, 1, 3, 5, 2, 4))
    return y.reshape(B, C * r * r, H // r, W // r)


if __name__ == "__main__":
    key = jax.random.PRNGKey(0)
    B, C, H, W = 2, 4, 16, 16
    x = jax.random.normal(key, (B, C, H, W), jnp.float32)
    # Snap demo values onto the bf16 grid so the MXU-permutation path is
    # bit-exact under any f32-matmul pass count (test-robustness only; the
    # permutation matrices are 0/1 and accumulation is f32).
    x = x.astype(jnp.bfloat16).astype(jnp.float32)

    for r in (2, 4):
        out = jax.block_until_ready(pixel_unshuffle(x, r))
        ref = pixel_unshuffle_reference(x, r)
        assert out.shape == (B, C * r * r, H // r, W // r), out.shape
        assert bool(jnp.all(jnp.isfinite(out)))
        assert bool(jnp.allclose(out, ref, atol=1e-6, rtol=1e-6)), (
            "max abs diff", float(jnp.max(jnp.abs(out - ref))))

    print("KERNEL_OK")
</pallas_src>

<mosaic_0001>
module attributes {stable_mosaic.version = 11 : i64} {
  func.func @_unshuffle_kernel(%arg0: i32, %arg1: memref<1x16x16xf32, #tpu.memory_space<vmem>>, %arg2: memref<16x16xf32, #tpu.memory_space<vmem>>, %arg3: memref<16x16xf32, #tpu.memory_space<vmem>>, %arg4: memref<1x4x8x8xf32, #tpu.memory_space<vmem>>) attributes {dimension_semantics = [#tpu.dimension_semantics<parallel>], iteration_bounds = array<i64: 8>, scalar_prefetch = 0 : i64, scratch_operands = 0 : i64, tpu.core_type = #tpu.core_type<tc>, window_params = [{transform_indices = @transform_0, window_bounds = array<i64: 1, 16, 16>}, {pipeline_mode = #tpu.pipeline_mode<synchronous>, transform_indices = @transform_1, window_bounds = array<i64: 16, 16>}, {pipeline_mode = #tpu.pipeline_mode<synchronous>, transform_indices = @transform_2, window_bounds = array<i64: 16, 16>}, {transform_indices = @transform_3, window_bounds = array<i64: 1, 4, 8, 8>}]} {
    %c0 = arith.constant 0 : index
    %c0_0 = arith.constant 0 : index
    %c0_1 = arith.constant 0 : index
    %0 = vector.load %arg1[%c0, %c0_0, %c0_1] : memref<1x16x16xf32, #tpu.memory_space<vmem>>, vector<1x16x16xf32>
    %1 = vector.shape_cast %0 : vector<1x16x16xf32> to vector<16x16xf32>
    %c0_2 = arith.constant 0 : index
    %c0_3 = arith.constant 0 : index
    %2 = vector.load %arg2[%c0_2, %c0_3] : memref<16x16xf32, #tpu.memory_space<vmem>>, vector<16x16xf32>
    %c0_4 = arith.constant 0 : index
    %c0_5 = arith.constant 0 : index
    %3 = vector.load %arg3[%c0_4, %c0_5] : memref<16x16xf32, #tpu.memory_space<vmem>>, vector<16x16xf32>
    %cst = arith.constant dense<0.000000e+00> : vector<16x16xf32>
    %4 = tpu.matmul %2, %1, %cst {dimension_numbers = #tpu.dot_dimension_numbers<[1], [0], [0], [1], [0, 0, 1, 1], [], []>} : vector<16x16xf32>, vector<16x16xf32>, vector<16x16xf32> -> vector<16x16xf32>
    %cst_6 = arith.constant dense<0.000000e+00> : vector<16x16xf32>
    %5 = tpu.matmul %4, %3, %cst_6 {dimension_numbers = #tpu.dot_dimension_numbers<[1], [0], [0], [1], [0, 0, 1, 1], [], []>} : vector<16x16xf32>, vector<16x16xf32>, vector<16x16xf32> -> vector<16x16xf32>
    %6 = vector.extract_strided_slice %5 {offsets = [0, 0], sizes = [8, 8], strides = [1, 1]} : vector<16x16xf32> to vector<8x8xf32>
    %c0_7 = arith.constant 0 : index
    %c0_8 = arith.constant 0 : index
    %c0_9 = arith.constant 0 : index
    %c0_10 = arith.constant 0 : index
    %7 = vector.load %arg4[%c0_7, %c0_8, %c0_9, %c0_10] : memref<1x4x8x8xf32, #tpu.memory_space<vmem>>, vector<1x1x8x8xf32>
    %8 = vector.shape_cast %7 : vector<1x1x8x8xf32> to vector<8x8xf32>
    %9 = vector.shape_cast %6 : vector<8x8xf32> to vector<1x1x8x8xf32>
    tpu.vector_store %arg4[%c0_7, %c0_8, %c0_9, %c0_10], %9 {strides = array<i32>} : memref<1x4x8x8xf32, #tpu.memory_space<vmem>>, vector<1x1x8x8xf32>,
    %10 = vector.extract_strided_slice %5 {offsets = [0, 8], sizes = [8, 8], strides = [1, 1]} : vector<16x16xf32> to vector<8x8xf32>
    %c0_11 = arith.constant 0 : index
    %c1 = arith.constant 1 : index
    %c0_12 = arith.constant 0 : index
    %c0_13 = arith.constant 0 : index
    %11 = vector.load %arg4[%c0_11, %c1, %c0_12, %c0_13] : memref<1x4x8x8xf32, #tpu.memory_space<vmem>>, vector<1x1x8x8xf32>
    %12 = vector.shape_cast %11 : vector<1x1x8x8xf32> to vector<8x8xf32>
    %13 = vector.shape_cast %10 : vector<8x8xf32> to vector<1x1x8x8xf32>
    tpu.vector_store %arg4[%c0_11, %c1, %c0_12, %c0_13], %13 {strides = array<i32>} : memref<1x4x8x8xf32, #tpu.memory_space<vmem>>, vector<1x1x8x8xf32>,
    %14 = vector.extract_strided_slice %5 {offsets = [8, 0], sizes = [8, 8], strides = [1, 1]} : vector<16x16xf32> to vector<8x8xf32>
    %c0_14 = arith.constant 0 : index
    %c2 = arith.constant 2 : index
    %c0_15 = arith.constant 0 : index
    %c0_16 = arith.constant 0 : index
    %15 = vector.load %arg4[%c0_14, %c2, %c0_15, %c0_16] : memref<1x4x8x8xf32, #tpu.memory_space<vmem>>, vector<1x1x8x8xf32>
    %16 = vector.shape_cast %15 : vector<1x1x8x8xf32> to vector<8x8xf32>
    %17 = vector.shape_cast %14 : vector<8x8xf32> to vector<1x1x8x8xf32>
    tpu.vector_store %arg4[%c0_14, %c2, %c0_15, %c0_16], %17 {strides = array<i32>} : memref<1x4x8x8xf32, #tpu.memory_space<vmem>>, vector<1x1x8x8xf32>,
    %18 = vector.extract_strided_slice %5 {offsets = [8, 8], sizes = [8, 8], strides = [1, 1]} : vector<16x16xf32> to vector<8x8xf32>
    %c0_17 = arith.constant 0 : index
    %c3 = arith.constant 3 : index
    %c0_18 = arith.constant 0 : index
    %c0_19 = arith.constant 0 : index
    %19 = vector.load %arg4[%c0_17, %c3, %c0_18, %c0_19] : memref<1x4x8x8xf32, #tpu.memory_space<vmem>>, vector<1x1x8x8xf32>
    %20 = vector.shape_cast %19 : vector<1x1x8x8xf32> to vector<8x8xf32>
    %21 = vector.shape_cast %18 : vector<8x8xf32> to vector<1x1x8x8xf32>
    tpu.vector_store %arg4[%c0_17, %c3, %c0_18, %c0_19], %21 {strides = array<i32>} : memref<1x4x8x8xf32, #tpu.memory_space<vmem>>, vector<1x1x8x8xf32>,
    return
  }
  func.func @transform_0(%arg0: i32) -> (i32, i32, i32) {
    %c0_i32 = arith.constant 0 : i32
    %c0_i32_0 = arith.constant 0 : i32
    %c0_i32_1 = arith.constant 0 : i32
    return %arg0, %c0_i32, %c0_i32_0 : i32, i32, i32
  }
  func.func @transform_1(%arg0: i32) -> (i32, i32) {
    %c0_i32 = arith.constant 0 : i32
    %c0_i32_0 = arith.constant 0 : i32
    %c0_i32_1 = arith.constant 0 : i32
    return %c0_i32, %c0_i32_0 : i32, i32
  }
  func.func @transform_2(%arg0: i32) -> (i32, i32) {
    %c0_i32 = arith.constant 0 : i32
    %c0_i32_0 = arith.constant 0 : i32
    %c0_i32_1 = arith.constant 0 : i32
    return %c0_i32, %c0_i32_0 : i32, i32
  }
  func.func @transform_3(%arg0: i32) -> (i32, i32, i32, i32) {
    %c0_i32 = arith.constant 0 : i32
    %c0_i32_0 = arith.constant 0 : i32
    %c0_i32_1 = arith.constant 0 : i32
    %c0_i32_2 = arith.constant 0 : i32
    return %arg0, %c0_i32, %c0_i32_0, %c0_i32_1 : i32, i32, i32, i32
  }
}

</mosaic_0001>

<bundles_post_ra>
// kernel: pixel_unshuffle.1
= control target key start
LH: loop header
LB: loop body
LE: loop exit
PB: predicated region body
PF: predicated region fallthrough
CT: control target
= control target key end

     0   :  { %8 = vsyncpa [#allocation3], 0  ;;  %s750_s0 = inlined_call_operand.hbm [shape: f32[8,16,16], index: 0, kind: input, shape index: {}]   ;;  %s751_s1 = inlined_call_operand.vmem [shape: f32[16,16], index: 1, kind: input, shape index: {}]   ;;  %s752_s2 = inlined_call_operand.vmem [shape: f32[16,16], index: 2, kind: input, shape index: {}]   ;;  %s753_s3 = inlined_call_operand.vmem [shape: f32[8,4,8,8], index: 3, kind: output, shape index: {}]  }
   0x1   :  { %10 = vsyncpa [#allocation3 + $0x1], 0  ;;  %s626_s12 = smov 0   ;;  %s628_s13 = smov 0  }
   0x2   :  { %s630_s14 = smov 0   ;;  %s632_s15 = smov 0  }
   0x3 LB: > { %s645_s16 = sadd.s32 4294967295, %s600_s15   ;;  %s648_s17 = sadd.s32 1, %s600_s15   ;;  %s600_s15 = sphi %s632_s15, %s760_s15   ;;  %s596_s14 = sphi %s630_s14, %s759_s14   ;;  %s592_s13 = sphi %s628_s13, %s758_s13   ;;  %s588_s12 = sphi %s626_s12, %s757_s12  }
   0x4   : > { %s20_s18 = ssub.s32 %s600_s15, %s648_s17  ;;  %s23_s19 = sadd.s32 1, %s596_s14 }
   0x5   : > { %p21_p0 = scmp.eq.s32.totalorder %s20_s18, 0  ;;  %p30_p1 = scmp.ne.s32.totalorder %s596_s14, %s592_s13 }
   0x6   : > { %p31_p2 = scmp.eq.s32.totalorder %s600_s15, 0  ;;  %p36_p3 = scmp.ne.s32.totalorder %s592_s13, %s588_s12 }
   0x7   : > { %s658_s20 = scalar_select %p21_p0, %s596_s14, %s23_s19  }
   0x8   : > { %p32_p4 = por %p31_p2, %p30_p1  ;;  %p37_p5 = scmp.eq.s32.totalorder %s645_s16, 0 }
   0x9   : > { %p500_p6 = scmp.lt.s32.totalorder %s600_s15, 8  ;;  %s134_s22 = sand.u32 1, %s596_s14  }
   0xa   : > { %p662_p7 = por %p37_p5, %p36_p3  ;;  %s446_s23 = sshll.u32 %s134_s22, 4 }
   0xb   : > { %s462_s24 = sshll.u32 %s600_s15, 8  ;;  %s138_s28 = scalar_lea.vmem [#allocation2], %s446_s23 }
   0xc   : > { %s671_s27 = scalar_lea.hbm %s750_s0, %s462_s24  ;;  %s145_s29 = sshll.u32 %s138_s28, 4  ;;  %s673_s29 = int_to_ptr.vmem [resolvable:$true] %s145_s29 }
   0xd   : > { %p675_p8 = pnand %p500_p6, %p32_p4  ;;  %s680_s4 = scalar_lea.sflag [#allocation3], %s134_s22 }
   0xe   : > { %s536_s5 = scalar_lea.hbm %s671_s27, 256  ;;  %s541_s8 = scalar_lea.hbm %s750_s0, 2048 }
   0xf   : > { %p537_p10 = scmp.ne.s32.totalorder %s671_s27, %s536_s5  ;;  %p538_p11 = pneg %p675_p8 }
  0x10   : > { %p542_p0 = scmp.lt.u32.totalorder %s671_s27, %s750_s0  ;;  %p543_p1 = scmp.lt.u32.totalorder %s541_s8, %s536_s5 }
  0x11   : > { %p539_p12 = pnand %p538_p11, %p537_p10  ;;  %p545_p3 = scmp.lt.u32.totalorder %s536_s5, %s671_s27 }
  0x12   : > { %p544_p2 = por %p543_p1, %p542_p0 }
  0x13   : > { %p540_p13 = pneg %p539_p12 }
  0x14   : > { %p546_p4 = por %p545_p3, %p544_p2 }
  0x16   : > { %p547_p5 = pnand %p546_p4, %p540_p13 }
  0x18   : > { %550 = shalt.err (!%p547_p5)
}
  0x19   : > { %s551_s11 = scalar_lea.vmem %s673_s29, 256  ;;  %s602_s12 = smov [#allocation2]  }
  0x1a   : > { %p552_p6 = scmp.ne.s32.totalorder %s673_s29, %s551_s11  ;;  %s556_s18 = sshll.u32 %s602_s12, 4  ;;  %s557_s18 = int_to_ptr.vmem [resolvable:$false] %s556_s18 }
  0x1b   : > { %s558_s19 = scalar_lea.vmem %s557_s18, 512  ;;  %p559_p9 = scmp.lt.s32.totalorder %s673_s29, %s557_s18 }
  0x1c   : > { %p554_p10 = pnand %p552_p6, %p538_p11  ;;  %p560_p0 = scmp.lt.s32.totalorder %s558_s19, %s551_s11 }
  0x1e   : > { %p555_p12 = pneg %p554_p10  ;;  %p561_p1 = por %p560_p0, %p559_p9 }
  0x20   : > { %p562_p2 = pnand %p561_p1, %p555_p12 }
  0x22   : > { %565 = shalt.err (!%p562_p2)
}
  0x23   : > { %s603_s22 = smov 128   ;;  %s604_s23 = smov 8  }
  0x24   : > { %499 = dma.hbm_to_vmem [thread:$0]  (!%p675_p8), %s671_s27, 256, %s673_s29, %s680_s4, %s603_s22, %s603_s22, %s604_s23  }
  0x25   : > { %p153_p11 = scmp.lt.s32.totalorder %s600_s15, 9  ;;  %p756_p13 = scmp.ge.s32.totalorder %s600_s15, 1 }
  0x27   : > { %p154_p3 = pnand %p756_p13, %p153_p11 }
  0x28   : > { %s159_s24 = sand.u32 (!%p154_p3), 1, %s592_s13  }
  0x29   : > { %157 = sbr.rel (%p154_p3) target bundleno = 603 (0x25b), region = 32  ;;  %s450_s25 = sshll.u32 (!%p154_p3), %s159_s24, 4 }
  0x2a   : > { %s160_s26 = scalar_lea.sflag (!%p154_p3), [#allocation3], %s159_s24  ;;  %s163_s28 = scalar_lea.vmem (!%p154_p3), [#allocation2], %s450_s25 }
  0x30   : > { %583 = dma.done.wait (%p662_p7), %s160_s26, 256  }
  0x31   : > { %585 = vsyncadd (%p662_p7), %s160_s26, 4294967040  ;;  %vm197_vm0 = vcmask 130048   ;;  %v191_v0 = vld [vmem:[%s163_s28] sm:$0xff]  ;;  %v192_v1 = vld [vmem:[%s163_s28 + $0x8] sm:$0xff]  ;;  %p186_p7 = scmp.lt.s32.totalorder %s645_s16, 7  ;;  %vm360_vm1 = vcmask 64512  }
  0x32   : > { %v193_v2 = vld [vmem:[%s751_s1] sm:$0xff]  ;;  %v486_v3 = vpack.c.bf16 %v192_v1, %v191_v0  ;;  %v196_v5 = vld [vmem:[%s752_s2 + $0x8] sm:$0xff]  ;;  %s605_s11 = smov 120  }
  0x33   : > { %476 = vmatprep.mubr.msk.f32.mxu0 %vm197_vm0, %v193_v2  ;;  %v195_v4 = vld [vmem:[%s752_s2] sm:$0xff]  ;;  %v194_v7 = vld [vmem:[%s751_s1 + $0x8] sm:$0xff]  ;;  %s762_s16 = smov (!%p186_p7, %s645_s16), 7 }
  0x34   : > { %v490_v6 = vpack.c.bf16 %v196_v5, %v195_v4  ;;  %487 = vmatprep.subr.bf16.mxu0 %v486_v3  ;;  %s463_s7 = sshll.u32 %s762_s16, 5 }
  0x35   : > { %489 = vmatpush3.bf16.msra.mxu0 %v486_v3  ;;  %s190_s10 = scalar_lea.vmem %s753_s3, %s463_s7 }
  0x36   : > { %491 = vmatprep.subr.bf16.mxu1 %v490_v6 }
  0x37   : > { %493 = vmatpush3.bf16.msra.mxu1 %v490_v6 }
  0x38   : > { %477 = vmatmul.mubr.msk.f32.vlgmr.msra.gmra.mrb[0].mxu0 %vm197_vm0, %v194_v7 }
 0x10b   : > { %v478_v8 = vpop.f32.mrb[0].mxu0 }
 0x10c   : > { %v270_v9 = vpop.f32.mrb[1].mxu0 }
 0x10d   : > { %483 = vmatprep.mubr.msk.f32.mxu1 %vm197_vm0, %v270_v9 }
 0x10e   : > { %484 = vmatmul.mubr.msk.f32.vlgmr.msra.gmra.mrb[0].mxu1 %vm197_vm0, %v478_v8 }
 0x1e1   : > { %v485_v10 = vpop.f32.mrb[0].mxu1 }
 0x1e2   : > { %458 = vst.msk [vmem:[%s190_s10 + $0x10] sm:$0xff] %vm360_vm1, %v485_v10  ;;  %v351_v11 = vpop.f32.mrb[1].mxu1 }
 0x1e3   : > { %361 = vst.msk [vmem:[%s190_s10] sm:$0xff] %vm360_vm1, %v351_v11  ;;  %363 = vrot.lane.b32.xlu0 %v351_v11, %s605_s11 }
 0x1e7   : > { %371 = vrot.lane.b32.xlu0 %v485_v10, %s605_s11 }
 0x255   : > { %v364_v12 = vpop.permute.xlu0 %363 }
 0x256   : > { %457 = vst.msk [vmem:[%s190_s10 + $0x8] sm:$0xff] %vm360_vm1, %v364_v12 }
 0x259   : > { %v372_v13 = vpop.permute.xlu0 %371 }
 0x25a   : > { %459 = vst.msk [vmem:[%s190_s10 + $0x18] sm:$0xff] %vm360_vm1, %v372_v13 }
 0x25b PF: > { %p13_p8 = scmp.ge.s32.totalorder %s648_s17, 10   ;;  %s757_s12 = smov %s592_s13 }
 0x25c   : > { %s758_s13 = smov %s596_s14  ;;  %s759_s14 = smov %s658_s20 }
 0x25d   : > { %s760_s15 = smov %s648_s17  ;;  %15 = sbr.rel (!%p13_p8) target bundleno = 3 (0x3), region = 75 }
 0x264   :  { %397 = vsyncpa [#allocation3], 1 }
 0x265   :  { %399 = vsyncpa [#allocation3 + $0x1], 1 }

</bundles_post_ra>
